<compile_context>
chip_gen: v6e
topology: v6e:2x2x1
jax: 0.10.0
libtpu: 0.0.40
codegen_flags: <defaults>
</compile_context>

<pallas_src>
import jax
import jax.numpy as jnp
from jax.experimental import pallas as pl
from jax.experimental.pallas import tpu as pltpu

HIDDEN = 256              # AttentionModule fc1 width (fixed at 256 in PyTorch)
MXU_DTYPE = jnp.bfloat16  # MXU operand dtype (bf16-native on v5e/v6e/v7x)
MAX_TILE_T = 512          # max temporal rows per grid step


def _dot(a, b):
    """MXU matmul: bf16 operands, f32 accumulation."""
    return jnp.dot(a.astype(MXU_DTYPE), b.astype(MXU_DTYPE),
                   preferred_element_type=jnp.float32)


# ---------------------------------------------------------------------------
# Fused kernel. Grid = (B, n_t): one batch element x one temporal row tile.
# Both streams (rgb, flow) are processed in the same body (no input restack).
# ---------------------------------------------------------------------------
def _fused_kernel(x_rgb_ref, x_flow_ref, w1_ref, b1_ref, w2_ref, b2_ref,
                  wc_ref, bc_ref, wcp_ref, wboth_ref, bboth_ref,
                  attn_rgb_ref, attn_flow_ref, tcam_rgb_ref, tcam_flow_ref,
                  cls_rgb_ref, cls_flow_ref, both_ref,
                  wt_rgb_acc, wt_flow_acc):
    t = pl.program_id(1)

    @pl.when(t == 0)
    def _():
        wt_rgb_acc[...] = jnp.zeros_like(wt_rgb_acc)
        wt_flow_acc[...] = jnp.zeros_like(wt_flow_acc)

    def run_stream(x_ref, s, attn_ref, tcam_ref, wt_acc):
        x = x_ref[...]                              # (tile_t, F)
        x_mxu = x.astype(MXU_DTYPE)

        # ---- AttentionModule: fc1 -> relu -> fc2 -> sigmoid ---------------
        h = jnp.dot(x_mxu, w1_ref[s],
                    preferred_element_type=jnp.float32) + b1_ref[s]
        h = jnp.maximum(h, 0.0)
        # fc2 as a VPU multiply + lane reduce (w2 is a [1, 256] row, f32);
        # its scalar bias comes from SMEM.
        logits = jnp.sum(h * w2_ref[s], axis=-1, keepdims=True) + b2_ref[s]
        attn = jax.nn.sigmoid(logits)               # (tile_t, 1), f32
        attn_ref[...] = attn

        # ---- StreamModule: attention-weighted temporal pooling (partial) --
        wt_acc[...] += jnp.sum(x.astype(jnp.float32) * attn,
                               axis=0, keepdims=True)

        # ---- TCAM: StreamClassificationHead.mlp_1 over every segment ------
        tcam_ref[...] = jnp.dot(x_mxu, wc_ref[s],
                                preferred_element_type=jnp.float32) + bc_ref[s]

    run_stream(x_rgb_ref, 0, attn_rgb_ref, tcam_rgb_ref, wt_rgb_acc)
    run_stream(x_flow_ref, 1, attn_flow_ref, tcam_flow_ref, wt_flow_acc)

    # ---- Pooled-feature heads at the last temporal tile of this batch el. --
    # Kept in f32 (tiny (1,F)@(F,C) matmuls): full precision for the pooled
    # features, negligible MXU cost relative to the tcam matmuls above.
    @pl.when(t == pl.num_programs(1) - 1)
    def _():
        wt_r = wt_rgb_acc[...]                      # (1, F) f32
        wt_f = wt_flow_acc[...]
        cls_rgb_ref[...] = jnp.dot(
            wt_r, wcp_ref[0], preferred_element_type=jnp.float32) + bc_ref[0]
        cls_flow_ref[...] = jnp.dot(
            wt_f, wcp_ref[1], preferred_element_type=jnp.float32) + bc_ref[1]
        both_ref[...] = jnp.dot(
            wt_r + wt_f, wboth_ref[...],
            preferred_element_type=jnp.float32) + bboth_ref[...]


# ---------------------------------------------------------------------------
# Parameter init (deterministic; mimics PyTorch nn.Linear uniform init).
# Only parameters the forward pass touches are created (mlp_2/3/4 and
# .classifier of StreamClassificationHead are unused by forward()).
# ---------------------------------------------------------------------------
def _linear_params(key, fan_in, fan_out):
    k_w, k_b = jax.random.split(key)
    bound = 1.0 / jnp.sqrt(fan_in)
    w = jax.random.uniform(k_w, (fan_in, fan_out), jnp.float32, -bound, bound)
    b = jax.random.uniform(k_b, (1, fan_out), jnp.float32, -bound, bound)
    return w, b


def init_params(key, feature_size, num_classes):
    keys = jax.random.split(key, 7)
    p = {}
    p["rgb_fc1_w"], p["rgb_fc1_b"] = _linear_params(keys[0], feature_size, HIDDEN)
    p["rgb_fc2_w"], p["rgb_fc2_b"] = _linear_params(keys[1], HIDDEN, 1)
    p["flow_fc1_w"], p["flow_fc1_b"] = _linear_params(keys[2], feature_size, HIDDEN)
    p["flow_fc2_w"], p["flow_fc2_b"] = _linear_params(keys[3], HIDDEN, 1)
    p["cls_rgb_w"], p["cls_rgb_b"] = _linear_params(keys[4], feature_size, num_classes)
    p["cls_flow_w"], p["cls_flow_b"] = _linear_params(keys[5], feature_size, num_classes)
    p["cls_both_w"], p["cls_both_b"] = _linear_params(keys[6], feature_size, num_classes)
    return p


def pack_params(p):
    """Stack per-stream weights on a leading axis; ship MXU operands as bf16.

    Done once, outside the jitted forward, so the kernel sees ready-to-use
    weight tiles and there is no per-call packing work.
    """
    bf = lambda w: w.astype(MXU_DTYPE)
    return {
        # bf16 MXU operands (halves HBM/VMEM for the resident weights).
        "w1": jnp.stack([bf(p["rgb_fc1_w"]), bf(p["flow_fc1_w"])]),   # [2, F, 256]
        "wc": jnp.stack([bf(p["cls_rgb_w"]), bf(p["cls_flow_w"])]),   # [2, F, C]
        # f32 copies of the classifier weights for the tiny pooled heads.
        "wc_pool": jnp.stack([p["cls_rgb_w"], p["cls_flow_w"]]),      # [2, F, C]
        "w_both": p["cls_both_w"],                                    # [F, C]
        # VPU-path weights / all biases stay f32.
        "b1": jnp.stack([p["rgb_fc1_b"], p["flow_fc1_b"]]),           # [2, 1, 256]
        "w2": jnp.stack([p["rgb_fc2_w"].T, p["flow_fc2_w"].T]),       # [2, 1, 256]
        "b2": jnp.stack([p["rgb_fc2_b"].reshape(()),
                         p["flow_fc2_b"].reshape(())]),               # [2]  (SMEM)
        "bc": jnp.stack([p["cls_rgb_b"], p["cls_flow_b"]]),           # [2, 1, C]
        "b_both": p["cls_both_b"],                                    # [1, C]
    }


def _choose_tile_t(T, max_tile=MAX_TILE_T):
    """Pick a temporal row-tile size (multiple of 8) and the padded T."""
    T8 = ((T + 7) // 8) * 8
    if T8 <= max_tile:
        return T8, T8
    for tile in range(max_tile - max_tile % 8, 7, -8):
        if T % tile == 0:
            return tile, T
    tile = max_tile
    return tile, ((T + tile - 1) // tile) * tile


# ---------------------------------------------------------------------------
# ActionClassification.forward
# ---------------------------------------------------------------------------
@jax.jit
def action_classification_forward(packed, rgb_features, flow_features):
    B, T, F = rgb_features.shape
    H = packed["w1"].shape[2]
    C = packed["wc"].shape[2]
    tile_t, Tp = _choose_tile_t(T)
    n_t = Tp // tile_t

    if Tp != T:
        # TODO(synk): zero-padding T costs one extra XLA pass over the inputs
        # and a slice on the outputs; feed T as a multiple of 8 to avoid it.
        pad = [(0, 0), (0, Tp - T), (0, 0)]
        rgb_features = jnp.pad(rgb_features, pad)
        flow_features = jnp.pad(flow_features, pad)

    (attn_rgb, attn_flow, tcam_rgb, tcam_flow,
     cls_rgb, cls_flow, class_both) = pl.pallas_call(
        _fused_kernel,
        out_shape=(
            jax.ShapeDtypeStruct((B, Tp, 1), jnp.float32),   # attn_rgb
            jax.ShapeDtypeStruct((B, Tp, 1), jnp.float32),   # attn_flow
            jax.ShapeDtypeStruct((B, Tp, C), jnp.float32),   # tcam_rgb (true C)
            jax.ShapeDtypeStruct((B, Tp, C), jnp.float32),   # tcam_flow
            jax.ShapeDtypeStruct((B, 1, C), jnp.float32),    # class_rgb
            jax.ShapeDtypeStruct((B, 1, C), jnp.float32),    # class_flow
            jax.ShapeDtypeStruct((B, 1, C), jnp.float32),    # class_both
        ),
        grid_spec=pltpu.PrefetchScalarGridSpec(
            num_scalar_prefetch=0,
            grid=(B, n_t),
            in_specs=[
                pl.BlockSpec((None, tile_t, F), lambda b, t: (b, t, 0)),  # rgb x
                pl.BlockSpec((None, tile_t, F), lambda b, t: (b, t, 0)),  # flow x
                pl.BlockSpec((2, F, H), lambda b, t: (0, 0, 0)),          # fc1 W (bf16)
                pl.BlockSpec((2, 1, H), lambda b, t: (0, 0, 0)),          # fc1 b
                pl.BlockSpec((2, 1, H), lambda b, t: (0, 0, 0)),          # fc2 W row
                pl.BlockSpec(memory_space=pltpu.MemorySpace.SMEM),        # fc2 b scalars
                pl.BlockSpec((2, F, C), lambda b, t: (0, 0, 0)),          # cls W (bf16)
                pl.BlockSpec((2, 1, C), lambda b, t: (0, 0, 0)),          # cls b
                pl.BlockSpec((2, F, C), lambda b, t: (0, 0, 0)),          # cls W (f32, pooled)
                pl.BlockSpec((F, C), lambda b, t: (0, 0)),                # W_both (f32)
                pl.BlockSpec((1, C), lambda b, t: (0, 0)),                # b_both
            ],
            out_specs=[
                pl.BlockSpec((None, tile_t, 1), lambda b, t: (b, t, 0)),
                pl.BlockSpec((None, tile_t, 1), lambda b, t: (b, t, 0)),
                pl.BlockSpec((None, tile_t, C), lambda b, t: (b, t, 0)),
                pl.BlockSpec((None, tile_t, C), lambda b, t: (b, t, 0)),
                pl.BlockSpec((None, 1, C), lambda b, t: (b, 0, 0)),
                pl.BlockSpec((None, 1, C), lambda b, t: (b, 0, 0)),
                pl.BlockSpec((None, 1, C), lambda b, t: (b, 0, 0)),
            ],
            scratch_shapes=[
                pltpu.VMEM((1, F), jnp.float32),   # wt accumulator (rgb)
                pltpu.VMEM((1, F), jnp.float32),   # wt accumulator (flow)
            ],
        ),
        compiler_params=pltpu.CompilerParams(
            dimension_semantics=("parallel", "arbitrary"),
            vmem_limit_bytes=48 * 1024 * 1024,
        ),
    )(rgb_features, flow_features,
      packed["w1"], packed["b1"], packed["w2"], packed["b2"],
      packed["wc"], packed["bc"], packed["wc_pool"],
      packed["w_both"], packed["b_both"])

    if Tp != T:
        attn_rgb, attn_flow = attn_rgb[:, :T], attn_flow[:, :T]
        tcam_rgb, tcam_flow = tcam_rgb[:, :T], tcam_flow[:, :T]

    # TODO(synk): opts.logger.histo_summary (tensorboard side effect on
    # wt_ft_rgb) has no Pallas/JAX equivalent and is skipped.
    return {
        "class_both": class_both[:, 0, :],
        "class_rgb": cls_rgb[:, 0, :],
        "class_flow": cls_flow[:, 0, :],
        "attn_rgb": attn_rgb,
        "attn_flow": attn_flow,
        "tcam_rgb": tcam_rgb,
        "tcam_flow": tcam_flow,
    }


# ---------------------------------------------------------------------------
# Plain-JAX reference (mirrors the kernel's bf16 MXU casts; correctness only)
# ---------------------------------------------------------------------------
def _reference_forward(p, rgb, flow):
    def stream(x, w1, b1, w2, b2, wc, bc):
        B, T, F = x.shape
        x2 = x.reshape(B * T, F)
        h = jnp.maximum(_dot(x2, w1) + b1, 0.0)
        logit = jnp.sum(h * w2.T, axis=-1, keepdims=True) + b2.reshape(())
        a = jax.nn.sigmoid(logit).reshape(B, T, 1)
        wt = jnp.sum(x * a, axis=1)                          # [B, F] f32
        tcam = (_dot(x2, wc) + bc).reshape(B, T, -1)
        return a, wt, tcam

    a_r, wt_r, tc_r = stream(rgb, p["rgb_fc1_w"], p["rgb_fc1_b"],
                             p["rgb_fc2_w"], p["rgb_fc2_b"],
                             p["cls_rgb_w"], p["cls_rgb_b"])
    a_f, wt_f, tc_f = stream(flow, p["flow_fc1_w"], p["flow_fc1_b"],
                             p["flow_fc2_w"], p["flow_fc2_b"],
                             p["cls_flow_w"], p["cls_flow_b"])
    return {
        "class_both": (wt_r + wt_f) @ p["cls_both_w"] + p["cls_both_b"],
        "class_rgb": wt_r @ p["cls_rgb_w"] + p["cls_rgb_b"],
        "class_flow": wt_f @ p["cls_flow_w"] + p["cls_flow_b"],
        "attn_rgb": a_r,
        "attn_flow": a_f,
        "tcam_rgb": tc_r,
        "tcam_flow": tc_f,
    }


if __name__ == "__main__":
    B, T, F, C = 2, 8, 32, 20   # batch, temporal segments, feature_size, num_classes

    key = jax.random.PRNGKey(0)
    k_params, k_rgb, k_flow = jax.random.split(key, 3)
    params = init_params(k_params, F, C)
    packed = pack_params(params)
    rgb_features = jax.random.normal(k_rgb, (B, T, F), jnp.float32)
    flow_features = jax.random.normal(k_flow, (B, T, F), jnp.float32)

    outputs = action_classification_forward(packed, rgb_features, flow_features)
    outputs = jax.block_until_ready(outputs)

    ref = _reference_forward(params, rgb_features, flow_features)
    for name in ref:
        assert outputs[name].shape == ref[name].shape, \
            (name, outputs[name].shape, ref[name].shape)
        err = float(jnp.max(jnp.abs(outputs[name] - ref[name])))
        assert err < 2e-3, f"{name}: max abs err {err}"

    print("KERNEL_OK")
</pallas_src>

<mosaic_0001>
module attributes {stable_mosaic.version = 11 : i64} {
  func.func @_fused_kernel(%arg0: i32, %arg1: i32, %arg2: memref<1x8x32xf32, #tpu.memory_space<vmem>>, %arg3: memref<1x8x32xf32, #tpu.memory_space<vmem>>, %arg4: memref<2x32x256xbf16, #tpu.memory_space<vmem>>, %arg5: memref<2x1x256xf32, #tpu.memory_space<vmem>>, %arg6: memref<2x1x256xf32, #tpu.memory_space<vmem>>, %arg7: memref<2xf32, #tpu.memory_space<smem>>, %arg8: memref<2x32x20xbf16, #tpu.memory_space<vmem>>, %arg9: memref<2x1x20xf32, #tpu.memory_space<vmem>>, %arg10: memref<2x32x20xf32, #tpu.memory_space<vmem>>, %arg11: memref<32x20xf32, #tpu.memory_space<vmem>>, %arg12: memref<1x20xf32, #tpu.memory_space<vmem>>, %arg13: memref<1x8x1xf32, #tpu.memory_space<vmem>>, %arg14: memref<1x8x1xf32, #tpu.memory_space<vmem>>, %arg15: memref<1x8x20xf32, #tpu.memory_space<vmem>>, %arg16: memref<1x8x20xf32, #tpu.memory_space<vmem>>, %arg17: memref<1x1x20xf32, #tpu.memory_space<vmem>>, %arg18: memref<1x1x20xf32, #tpu.memory_space<vmem>>, %arg19: memref<1x1x20xf32, #tpu.memory_space<vmem>>, %arg20: memref<1x32xf32, #tpu.memory_space<vmem>>, %arg21: memref<1x32xf32, #tpu.memory_space<vmem>>) attributes {dimension_semantics = [#tpu.dimension_semantics<parallel>, #tpu.dimension_semantics<arbitrary>], iteration_bounds = array<i64: 2, 1>, scalar_prefetch = 0 : i64, scratch_operands = 2 : i64, tpu.core_type = #tpu.core_type<tc>, window_params = [{transform_indices = @transform_0, window_bounds = array<i64: 1, 8, 32>}, {transform_indices = @transform_1, window_bounds = array<i64: 1, 8, 32>}, {pipeline_mode = #tpu.pipeline_mode<synchronous>, transform_indices = @transform_2, window_bounds = array<i64: 2, 32, 256>}, {pipeline_mode = #tpu.pipeline_mode<synchronous>, transform_indices = @transform_3, window_bounds = array<i64: 2, 1, 256>}, {pipeline_mode = #tpu.pipeline_mode<synchronous>, transform_indices = @transform_4, window_bounds = array<i64: 2, 1, 256>}, {transform_indices = @transform_5, window_bounds = array<i64: 2>}, {pipeline_mode = #tpu.pipeline_mode<synchronous>, transform_indices = @transform_6, window_bounds = array<i64: 2, 32, 20>}, {pipeline_mode = #tpu.pipeline_mode<synchronous>, transform_indices = @transform_7, window_bounds = array<i64: 2, 1, 20>}, {pipeline_mode = #tpu.pipeline_mode<synchronous>, transform_indices = @transform_8, window_bounds = array<i64: 2, 32, 20>}, {pipeline_mode = #tpu.pipeline_mode<synchronous>, transform_indices = @transform_9, window_bounds = array<i64: 32, 20>}, {pipeline_mode = #tpu.pipeline_mode<synchronous>, transform_indices = @transform_10, window_bounds = array<i64: 1, 20>}, {transform_indices = @transform_11, window_bounds = array<i64: 1, 8, 1>}, {transform_indices = @transform_12, window_bounds = array<i64: 1, 8, 1>}, {transform_indices = @transform_13, window_bounds = array<i64: 1, 8, 20>}, {transform_indices = @transform_14, window_bounds = array<i64: 1, 8, 20>}, {transform_indices = @transform_15, window_bounds = array<i64: 1, 1, 20>}, {transform_indices = @transform_16, window_bounds = array<i64: 1, 1, 20>}, {transform_indices = @transform_17, window_bounds = array<i64: 1, 1, 20>}]} {
    %c0_i32 = arith.constant 0 : i32
    %0 = arith.cmpi eq, %arg1, %c0_i32 : i32
    %1 = arith.extui %0 : i1 to i32
    %c0_i32_0 = arith.constant 0 : i32
    %2 = arith.cmpi ne, %1, %c0_i32_0 : i32
    scf.if %2 {
      %cst_70 = arith.constant 0.000000e+00 : f32
      %98 = vector.broadcast %cst_70 : f32 to vector<1x32xf32>
      %c0_71 = arith.constant 0 : index
      %c0_72 = arith.constant 0 : index
      %99 = vector.load %arg20[%c0_71, %c0_72] : memref<1x32xf32, #tpu.memory_space<vmem>>, vector<1x32xf32>
      tpu.vector_store %arg20[%c0_71, %c0_72], %98 {strides = array<i32>} : memref<1x32xf32, #tpu.memory_space<vmem>>, vector<1x32xf32>,
      %cst_73 = arith.constant 0.000000e+00 : f32
      %100 = vector.broadcast %cst_73 : f32 to vector<1x32xf32>
      %c0_74 = arith.constant 0 : index
      %c0_75 = arith.constant 0 : index
      %101 = vector.load %arg21[%c0_74, %c0_75] : memref<1x32xf32, #tpu.memory_space<vmem>>, vector<1x32xf32>
      tpu.vector_store %arg21[%c0_74, %c0_75], %100 {strides = array<i32>} : memref<1x32xf32, #tpu.memory_space<vmem>>, vector<1x32xf32>,
    } else {
    }
    %c0 = arith.constant 0 : index
    %c0_1 = arith.constant 0 : index
    %c0_2 = arith.constant 0 : index
    %3 = vector.load %arg2[%c0, %c0_1, %c0_2] : memref<1x8x32xf32, #tpu.memory_space<vmem>>, vector<1x8x32xf32>
    %4 = vector.shape_cast %3 : vector<1x8x32xf32> to vector<8x32xf32>
    %5 = arith.truncf %4 : vector<8x32xf32> to vector<8x32xbf16>
    %c0_3 = arith.constant 0 : index
    %c0_4 = arith.constant 0 : index
    %c0_5 = arith.constant 0 : index
    %6 = vector.load %arg4[%c0_3, %c0_4, %c0_5] : memref<2x32x256xbf16, #tpu.memory_space<vmem>>, vector<1x32x256xbf16>
    %7 = vector.shape_cast %6 : vector<1x32x256xbf16> to vector<32x256xbf16>
    %cst = arith.constant dense<0.000000e+00> : vector<8x256xf32>
    %8 = tpu.matmul %5, %7, %cst {dimension_numbers = #tpu.dot_dimension_numbers<[1], [0], [0], [1], [0, 0, 1, 1], [], []>} : vector<8x32xbf16>, vector<32x256xbf16>, vector<8x256xf32> -> vector<8x256xf32>
    %c0_6 = arith.constant 0 : index
    %c0_7 = arith.constant 0 : index
    %c0_8 = arith.constant 0 : index
    %9 = vector.load %arg5[%c0_6, %c0_7, %c0_8] : memref<2x1x256xf32, #tpu.memory_space<vmem>>, vector<1x1x256xf32>
    %10 = vector.shape_cast %9 : vector<1x1x256xf32> to vector<1x256xf32>
    %11 = vector.broadcast %10 : vector<1x256xf32> to vector<8x256xf32>
    %12 = arith.addf %8, %11 : vector<8x256xf32>
    %cst_9 = arith.constant 0.000000e+00 : f32
    %13 = vector.broadcast %cst_9 : f32 to vector<8x256xf32>
    %14 = arith.maximumf %12, %13 : vector<8x256xf32>
    %c0_10 = arith.constant 0 : index
    %c0_11 = arith.constant 0 : index
    %c0_12 = arith.constant 0 : index
    %15 = vector.load %arg6[%c0_10, %c0_11, %c0_12] : memref<2x1x256xf32, #tpu.memory_space<vmem>>, vector<1x1x256xf32>
    %16 = vector.shape_cast %15 : vector<1x1x256xf32> to vector<1x256xf32>
    %17 = vector.broadcast %16 : vector<1x256xf32> to vector<8x256xf32>
    %18 = arith.mulf %14, %17 : vector<8x256xf32>
    %cst_13 = arith.constant dense<0.000000e+00> : vector<8xf32>
    %19 = vector.multi_reduction <add>, %18, %cst_13 [1] : vector<8x256xf32> to vector<8xf32>
    %20 = vector.shape_cast %19 : vector<8xf32> to vector<8x1xf32>
    %c0_14 = arith.constant 0 : index
    %21 = memref.load %arg7[%c0_14] : memref<2xf32, #tpu.memory_space<smem>>
    %22 = vector.broadcast %21 : f32 to vector<8x1xf32>
    %23 = arith.addf %20, %22 : vector<8x1xf32>
    %24 = arith.negf %23 : vector<8x1xf32>
    %25 = math.exp %24 : vector<8x1xf32>
    %cst_15 = arith.constant 1.000000e+00 : f32
    %26 = vector.broadcast %cst_15 : f32 to vector<8x1xf32>
    %27 = arith.addf %26, %25 : vector<8x1xf32>
    %28 = arith.divf %26, %27 : vector<8x1xf32>
    %c0_16 = arith.constant 0 : index
    %c0_17 = arith.constant 0 : index
    %c0_18 = arith.constant 0 : index
    %29 = vector.load %arg13[%c0_16, %c0_17, %c0_18] : memref<1x8x1xf32, #tpu.memory_space<vmem>>, vector<1x8x1xf32>
    %30 = vector.shape_cast %29 : vector<1x8x1xf32> to vector<8x1xf32>
    %31 = vector.shape_cast %28 : vector<8x1xf32> to vector<1x8x1xf32>
    tpu.vector_store %arg13[%c0_16, %c0_17, %c0_18], %31 {strides = array<i32>} : memref<1x8x1xf32, #tpu.memory_space<vmem>>, vector<1x8x1xf32>,
    %c0_19 = arith.constant 0 : index
    %c0_20 = arith.constant 0 : index
    %32 = vector.load %arg20[%c0_19, %c0_20] : memref<1x32xf32, #tpu.memory_space<vmem>>, vector<1x32xf32>
    %33 = vector.broadcast %28 : vector<8x1xf32> to vector<8x32xf32>
    %34 = arith.mulf %4, %33 : vector<8x32xf32>
    %cst_21 = arith.constant dense<0.000000e+00> : vector<32xf32>
    %35 = vector.multi_reduction <add>, %34, %cst_21 [0] : vector<8x32xf32> to vector<32xf32>
    %36 = vector.shape_cast %35 : vector<32xf32> to vector<1x32xf32>
    %37 = arith.addf %32, %36 : vector<1x32xf32>
    %c0_22 = arith.constant 0 : index
    %c0_23 = arith.constant 0 : index
    %38 = vector.load %arg20[%c0_22, %c0_23] : memref<1x32xf32, #tpu.memory_space<vmem>>, vector<1x32xf32>
    tpu.vector_store %arg20[%c0_22, %c0_23], %37 {strides = array<i32>} : memref<1x32xf32, #tpu.memory_space<vmem>>, vector<1x32xf32>,
    %c0_24 = arith.constant 0 : index
    %c0_25 = arith.constant 0 : index
    %c0_26 = arith.constant 0 : index
    %39 = vector.load %arg8[%c0_24, %c0_25, %c0_26] : memref<2x32x20xbf16, #tpu.memory_space<vmem>>, vector<1x32x20xbf16>
    %40 = vector.shape_cast %39 : vector<1x32x20xbf16> to vector<32x20xbf16>
    %cst_27 = arith.constant dense<0.000000e+00> : vector<8x20xf32>
    %41 = tpu.matmul %5, %40, %cst_27 {dimension_numbers = #tpu.dot_dimension_numbers<[1], [0], [0], [1], [0, 0, 1, 1], [], []>} : vector<8x32xbf16>, vector<32x20xbf16>, vector<8x20xf32> -> vector<8x20xf32>
    %c0_28 = arith.constant 0 : index
    %c0_29 = arith.constant 0 : index
    %c0_30 = arith.constant 0 : index
    %42 = vector.load %arg9[%c0_28, %c0_29, %c0_30] : memref<2x1x20xf32, #tpu.memory_space<vmem>>, vector<1x1x20xf32>
    %43 = vector.shape_cast %42 : vector<1x1x20xf32> to vector<1x20xf32>
    %44 = vector.broadcast %43 : vector<1x20xf32> to vector<8x20xf32>
    %45 = arith.addf %41, %44 : vector<8x20xf32>
    %c0_31 = arith.constant 0 : index
    %c0_32 = arith.constant 0 : index
    %c0_33 = arith.constant 0 : index
    %46 = vector.load %arg15[%c0_31, %c0_32, %c0_33] : memref<1x8x20xf32, #tpu.memory_space<vmem>>, vector<1x8x20xf32>
    %47 = vector.shape_cast %46 : vector<1x8x20xf32> to vector<8x20xf32>
    %48 = vector.shape_cast %45 : vector<8x20xf32> to vector<1x8x20xf32>
    tpu.vector_store %arg15[%c0_31, %c0_32, %c0_33], %48 {strides = array<i32>} : memref<1x8x20xf32, #tpu.memory_space<vmem>>, vector<1x8x20xf32>,
    %c0_34 = arith.constant 0 : index
    %c0_35 = arith.constant 0 : index
    %c0_36 = arith.constant 0 : index
    %49 = vector.load %arg3[%c0_34, %c0_35, %c0_36] : memref<1x8x32xf32, #tpu.memory_space<vmem>>, vector<1x8x32xf32>
    %50 = vector.shape_cast %49 : vector<1x8x32xf32> to vector<8x32xf32>
    %51 = arith.truncf %50 : vector<8x32xf32> to vector<8x32xbf16>
    %c1 = arith.constant 1 : index
    %c0_37 = arith.constant 0 : index
    %c0_38 = arith.constant 0 : index
    %52 = vector.load %arg4[%c1, %c0_37, %c0_38] : memref<2x32x256xbf16, #tpu.memory_space<vmem>>, vector<1x32x256xbf16>
    %53 = vector.shape_cast %52 : vector<1x32x256xbf16> to vector<32x256xbf16>
    %cst_39 = arith.constant dense<0.000000e+00> : vector<8x256xf32>
    %54 = tpu.matmul %51, %53, %cst_39 {dimension_numbers = #tpu.dot_dimension_numbers<[1], [0], [0], [1], [0, 0, 1, 1], [], []>} : vector<8x32xbf16>, vector<32x256xbf16>, vector<8x256xf32> -> vector<8x256xf32>
    %c1_40 = arith.constant 1 : index
    %c0_41 = arith.constant 0 : index
    %c0_42 = arith.constant 0 : index
    %55 = vector.load %arg5[%c1_40, %c0_41, %c0_42] : memref<2x1x256xf32, #tpu.memory_space<vmem>>, vector<1x1x256xf32>
    %56 = vector.shape_cast %55 : vector<1x1x256xf32> to vector<1x256xf32>
    %57 = vector.broadcast %56 : vector<1x256xf32> to vector<8x256xf32>
    %58 = arith.addf %54, %57 : vector<8x256xf32>
    %cst_43 = arith.constant 0.000000e+00 : f32
    %59 = vector.broadcast %cst_43 : f32 to vector<8x256xf32>
    %60 = arith.maximumf %58, %59 : vector<8x256xf32>
    %c1_44 = arith.constant 1 : index
    %c0_45 = arith.constant 0 : index
    %c0_46 = arith.constant 0 : index
    %61 = vector.load %arg6[%c1_44, %c0_45, %c0_46] : memref<2x1x256xf32, #tpu.memory_space<vmem>>, vector<1x1x256xf32>
    %62 = vector.shape_cast %61 : vector<1x1x256xf32> to vector<1x256xf32>
    %63 = vector.broadcast %62 : vector<1x256xf32> to vector<8x256xf32>
    %64 = arith.mulf %60, %63 : vector<8x256xf32>
    %cst_47 = arith.constant dense<0.000000e+00> : vector<8xf32>
    %65 = vector.multi_reduction <add>, %64, %cst_47 [1] : vector<8x256xf32> to vector<8xf32>
    %66 = vector.shape_cast %65 : vector<8xf32> to vector<8x1xf32>
    %c1_48 = arith.constant 1 : index
    %67 = memref.load %arg7[%c1_48] : memref<2xf32, #tpu.memory_space<smem>>
    %68 = vector.broadcast %67 : f32 to vector<8x1xf32>
    %69 = arith.addf %66, %68 : vector<8x1xf32>
    %70 = arith.negf %69 : vector<8x1xf32>
    %71 = math.exp %70 : vector<8x1xf32>
    %cst_49 = arith.constant 1.000000e+00 : f32
    %72 = vector.broadcast %cst_49 : f32 to vector<8x1xf32>
    %73 = arith.addf %72, %71 : vector<8x1xf32>
    %74 = arith.divf %72, %73 : vector<8x1xf32>
    %c0_50 = arith.constant 0 : index
    %c0_51 = arith.constant 0 : index
    %c0_52 = arith.constant 0 : index
    %75 = vector.load %arg14[%c0_50, %c0_51, %c0_52] : memref<1x8x1xf32, #tpu.memory_space<vmem>>, vector<1x8x1xf32>
    %76 = vector.shape_cast %75 : vector<1x8x1xf32> to vector<8x1xf32>
    %77 = vector.shape_cast %74 : vector<8x1xf32> to vector<1x8x1xf32>
    tpu.vector_store %arg14[%c0_50, %c0_51, %c0_52], %77 {strides = array<i32>} : memref<1x8x1xf32, #tpu.memory_space<vmem>>, vector<1x8x1xf32>,
    %c0_53 = arith.constant 0 : index
    %c0_54 = arith.constant 0 : index
    %78 = vector.load %arg21[%c0_53, %c0_54] : memref<1x32xf32, #tpu.memory_space<vmem>>, vector<1x32xf32>
    %79 = vector.broadcast %74 : vector<8x1xf32> to vector<8x32xf32>
    %80 = arith.mulf %50, %79 : vector<8x32xf32>
    %cst_55 = arith.constant dense<0.000000e+00> : vector<32xf32>
    %81 = vector.multi_reduction <add>, %80, %cst_55 [0] : vector<8x32xf32> to vector<32xf32>
    %82 = vector.shape_cast %81 : vector<32xf32> to vector<1x32xf32>
    %83 = arith.addf %78, %82 : vector<1x32xf32>
    %c0_56 = arith.constant 0 : index
    %c0_57 = arith.constant 0 : index
    %84 = vector.load %arg21[%c0_56, %c0_57] : memref<1x32xf32, #tpu.memory_space<vmem>>, vector<1x32xf32>
    tpu.vector_store %arg21[%c0_56, %c0_57], %83 {strides = array<i32>} : memref<1x32xf32, #tpu.memory_space<vmem>>, vector<1x32xf32>,
    %c1_58 = arith.constant 1 : index
    %c0_59 = arith.constant 0 : index
    %c0_60 = arith.constant 0 : index
    %85 = vector.load %arg8[%c1_58, %c0_59, %c0_60] : memref<2x32x20xbf16, #tpu.memory_space<vmem>>, vector<1x32x20xbf16>
    %86 = vector.shape_cast %85 : vector<1x32x20xbf16> to vector<32x20xbf16>
    %cst_61 = arith.constant dense<0.000000e+00> : vector<8x20xf32>
    %87 = tpu.matmul %51, %86, %cst_61 {dimension_numbers = #tpu.dot_dimension_numbers<[1], [0], [0], [1], [0, 0, 1, 1], [], []>} : vector<8x32xbf16>, vector<32x20xbf16>, vector<8x20xf32> -> vector<8x20xf32>
    %c1_62 = arith.constant 1 : index
    %c0_63 = arith.constant 0 : index
    %c0_64 = arith.constant 0 : index
    %88 = vector.load %arg9[%c1_62, %c0_63, %c0_64] : memref<2x1x20xf32, #tpu.memory_space<vmem>>, vector<1x1x20xf32>
    %89 = vector.shape_cast %88 : vector<1x1x20xf32> to vector<1x20xf32>
    %90 = vector.broadcast %89 : vector<1x20xf32> to vector<8x20xf32>
    %91 = arith.addf %87, %90 : vector<8x20xf32>
    %c0_65 = arith.constant 0 : index
    %c0_66 = arith.constant 0 : index
    %c0_67 = arith.constant 0 : index
    %92 = vector.load %arg16[%c0_65, %c0_66, %c0_67] : memref<1x8x20xf32, #tpu.memory_space<vmem>>, vector<1x8x20xf32>
    %93 = vector.shape_cast %92 : vector<1x8x20xf32> to vector<8x20xf32>
    %94 = vector.shape_cast %91 : vector<8x20xf32> to vector<1x8x20xf32>
    tpu.vector_store %arg16[%c0_65, %c0_66, %c0_67], %94 {strides = array<i32>} : memref<1x8x20xf32, #tpu.memory_space<vmem>>, vector<1x8x20xf32>,
    %c0_i32_68 = arith.constant 0 : i32
    %95 = arith.cmpi eq, %arg1, %c0_i32_68 : i32
    %96 = arith.extui %95 : i1 to i32
    %c0_i32_69 = arith.constant 0 : i32
    %97 = arith.cmpi ne, %96, %c0_i32_69 : i32
    scf.if %97 {
      %c0_70 = arith.constant 0 : index
      %c0_71 = arith.constant 0 : index
      %98 = vector.load %arg20[%c0_70, %c0_71] : memref<1x32xf32, #tpu.memory_space<vmem>>, vector<1x32xf32>
      %c0_72 = arith.constant 0 : index
      %c0_73 = arith.constant 0 : index
      %99 = vector.load %arg21[%c0_72, %c0_73] : memref<1x32xf32, #tpu.memory_space<vmem>>, vector<1x32xf32>
      %c0_74 = arith.constant 0 : index
      %c0_75 = arith.constant 0 : index
      %c0_76 = arith.constant 0 : index
      %100 = vector.load %arg10[%c0_74, %c0_75, %c0_76] : memref<2x32x20xf32, #tpu.memory_space<vmem>>, vector<1x32x20xf32>
      %101 = vector.shape_cast %100 : vector<1x32x20xf32> to vector<32x20xf32>
      %cst_77 = arith.constant dense<0.000000e+00> : vector<1x20xf32>
      %102 = tpu.matmul %98, %101, %cst_77 {dimension_numbers = #tpu.dot_dimension_numbers<[1], [0], [0], [1], [0, 0, 1, 1], [], []>} : vector<1x32xf32>, vector<32x20xf32>, vector<1x20xf32> -> vector<1x20xf32>
      %c0_78 = arith.constant 0 : index
      %c0_79 = arith.constant 0 : index
      %c0_80 = arith.constant 0 : index
      %103 = vector.load %arg9[%c0_78, %c0_79, %c0_80] : memref<2x1x20xf32, #tpu.memory_space<vmem>>, vector<1x1x20xf32>
      %104 = vector.shape_cast %103 : vector<1x1x20xf32> to vector<1x20xf32>
      %105 = arith.addf %102, %104 : vector<1x20xf32>
      %c0_81 = arith.constant 0 : index
      %c0_82 = arith.constant 0 : index
      %c0_83 = arith.constant 0 : index
      %106 = vector.load %arg17[%c0_81, %c0_82, %c0_83] : memref<1x1x20xf32, #tpu.memory_space<vmem>>, vector<1x1x20xf32>
      %107 = vector.shape_cast %106 : vector<1x1x20xf32> to vector<1x20xf32>
      %108 = vector.shape_cast %105 : vector<1x20xf32> to vector<1x1x20xf32>
      tpu.vector_store %arg17[%c0_81, %c0_82, %c0_83], %108 {strides = array<i32>} : memref<1x1x20xf32, #tpu.memory_space<vmem>>, vector<1x1x20xf32>,
      %c1_84 = arith.constant 1 : index
      %c0_85 = arith.constant 0 : index
      %c0_86 = arith.constant 0 : index
      %109 = vector.load %arg10[%c1_84, %c0_85, %c0_86] : memref<2x32x20xf32, #tpu.memory_space<vmem>>, vector<1x32x20xf32>
      %110 = vector.shape_cast %109 : vector<1x32x20xf32> to vector<32x20xf32>
      %cst_87 = arith.constant dense<0.000000e+00> : vector<1x20xf32>
      %111 = tpu.matmul %99, %110, %cst_87 {dimension_numbers = #tpu.dot_dimension_numbers<[1], [0], [0], [1], [0, 0, 1, 1], [], []>} : vector<1x32xf32>, vector<32x20xf32>, vector<1x20xf32> -> vector<1x20xf32>
      %c1_88 = arith.constant 1 : index
      %c0_89 = arith.constant 0 : index
      %c0_90 = arith.constant 0 : index
      %112 = vector.load %arg9[%c1_88, %c0_89, %c0_90] : memref<2x1x20xf32, #tpu.memory_space<vmem>>, vector<1x1x20xf32>
      %113 = vector.shape_cast %112 : vector<1x1x20xf32> to vector<1x20xf32>
      %114 = arith.addf %111, %113 : vector<1x20xf32>
      %c0_91 = arith.constant 0 : index
      %c0_92 = arith.constant 0 : index
      %c0_93 = arith.constant 0 : index
      %115 = vector.load %arg18[%c0_91, %c0_92, %c0_93] : memref<1x1x20xf32, #tpu.memory_space<vmem>>, vector<1x1x20xf32>
      %116 = vector.shape_cast %115 : vector<1x1x20xf32> to vector<1x20xf32>
      %117 = vector.shape_cast %114 : vector<1x20xf32> to vector<1x1x20xf32>
      tpu.vector_store %arg18[%c0_91, %c0_92, %c0_93], %117 {strides = array<i32>} : memref<1x1x20xf32, #tpu.memory_space<vmem>>, vector<1x1x20xf32>,
      %118 = arith.addf %98, %99 : vector<1x32xf32>
      %c0_94 = arith.constant 0 : index
      %c0_95 = arith.constant 0 : index
      %119 = vector.load %arg11[%c0_94, %c0_95] : memref<32x20xf32, #tpu.memory_space<vmem>>, vector<32x20xf32>
      %cst_96 = arith.constant dense<0.000000e+00> : vector<1x20xf32>
      %120 = tpu.matmul %118, %119, %cst_96 {dimension_numbers = #tpu.dot_dimension_numbers<[1], [0], [0], [1], [0, 0, 1, 1], [], []>} : vector<1x32xf32>, vector<32x20xf32>, vector<1x20xf32> -> vector<1x20xf32>
      %c0_97 = arith.constant 0 : index
      %c0_98 = arith.constant 0 : index
      %121 = vector.load %arg12[%c0_97, %c0_98] : memref<1x20xf32, #tpu.memory_space<vmem>>, vector<1x20xf32>
      %122 = arith.addf %120, %121 : vector<1x20xf32>
      %c0_99 = arith.constant 0 : index
      %c0_100 = arith.constant 0 : index
      %c0_101 = arith.constant 0 : index
      %123 = vector.load %arg19[%c0_99, %c0_100, %c0_101] : memref<1x1x20xf32, #tpu.memory_space<vmem>>, vector<1x1x20xf32>
      %124 = vector.shape_cast %123 : vector<1x1x20xf32> to vector<1x20xf32>
      %125 = vector.shape_cast %122 : vector<1x20xf32> to vector<1x1x20xf32>
      tpu.vector_store %arg19[%c0_99, %c0_100, %c0_101], %125 {strides = array<i32>} : memref<1x1x20xf32, #tpu.memory_space<vmem>>, vector<1x1x20xf32>,
    } else {
    }
    return
  }
  func.func @transform_0(%arg0: i32, %arg1: i32) -> (i32, i32, i32) {
    %c0_i32 = arith.constant 0 : i32
    %c0_i32_0 = arith.constant 0 : i32
    return %arg0, %arg1, %c0_i32 : i32, i32, i32
  }
  func.func @transform_1(%arg0: i32, %arg1: i32) -> (i32, i32, i32) {
    %c0_i32 = arith.constant 0 : i32
    %c0_i32_0 = arith.constant 0 : i32
    return %arg0, %arg1, %c0_i32 : i32, i32, i32
  }
  func.func @transform_2(%arg0: i32, %arg1: i32) -> (i32, i32, i32) {
    %c0_i32 = arith.constant 0 : i32
    %c0_i32_0 = arith.constant 0 : i32
    %c0_i32_1 = arith.constant 0 : i32
    %c0_i32_2 = arith.constant 0 : i32
    return %c0_i32, %c0_i32_0, %c0_i32_1 : i32, i32, i32
  }
  func.func @transform_3(%arg0: i32, %arg1: i32) -> (i32, i32, i32) {
    %c0_i32 = arith.constant 0 : i32
    %c0_i32_0 = arith.constant 0 : i32
    %c0_i32_1 = arith.constant 0 : i32
    %c0_i32_2 = arith.constant 0 : i32
    return %c0_i32, %c0_i32_0, %c0_i32_1 : i32, i32, i32
  }
  func.func @transform_4(%arg0: i32, %arg1: i32) -> (i32, i32, i32) {
    %c0_i32 = arith.constant 0 : i32
    %c0_i32_0 = arith.constant 0 : i32
    %c0_i32_1 = arith.constant 0 : i32
    %c0_i32_2 = arith.constant 0 : i32
    return %c0_i32, %c0_i32_0, %c0_i32_1 : i32, i32, i32
  }
  func.func @transform_5(%arg0: i32, %arg1: i32) -> i32 {
    %c0_i32 = arith.constant 0 : i32
    %c0_i32_0 = arith.constant 0 : i32
    return %c0_i32 : i32
  }
  func.func @transform_6(%arg0: i32, %arg1: i32) -> (i32, i32, i32) {
    %c0_i32 = arith.constant 0 : i32
    %c0_i32_0 = arith.constant 0 : i32
    %c0_i32_1 = arith.constant 0 : i32
    %c0_i32_2 = arith.constant 0 : i32
    return %c0_i32, %c0_i32_0, %c0_i32_1 : i32, i32, i32
  }
  func.func @transform_7(%arg0: i32, %arg1: i32) -> (i32, i32, i32) {
    %c0_i32 = arith.constant 0 : i32
    %c0_i32_0 = arith.constant 0 : i32
    %c0_i32_1 = arith.constant 0 : i32
    %c0_i32_2 = arith.constant 0 : i32
    return %c0_i32, %c0_i32_0, %c0_i32_1 : i32, i32, i32
  }
  func.func @transform_8(%arg0: i32, %arg1: i32) -> (i32, i32, i32) {
    %c0_i32 = arith.constant 0 : i32
    %c0_i32_0 = arith.constant 0 : i32
    %c0_i32_1 = arith.constant 0 : i32
    %c0_i32_2 = arith.constant 0 : i32
    return %c0_i32, %c0_i32_0, %c0_i32_1 : i32, i32, i32
  }
  func.func @transform_9(%arg0: i32, %arg1: i32) -> (i32, i32) {
    %c0_i32 = arith.constant 0 : i32
    %c0_i32_0 = arith.constant 0 : i32
    %c0_i32_1 = arith.constant 0 : i32
    return %c0_i32, %c0_i32_0 : i32, i32
  }
  func.func @transform_10(%arg0: i32, %arg1: i32) -> (i32, i32) {
    %c0_i32 = arith.constant 0 : i32
    %c0_i32_0 = arith.constant 0 : i32
    %c0_i32_1 = arith.constant 0 : i32
    return %c0_i32, %c0_i32_0 : i32, i32
  }
  func.func @transform_11(%arg0: i32, %arg1: i32) -> (i32, i32, i32) {
    %c0_i32 = arith.constant 0 : i32
    %c0_i32_0 = arith.constant 0 : i32
    return %arg0, %arg1, %c0_i32 : i32, i32, i32
  }
  func.func @transform_12(%arg0: i32, %arg1: i32) -> (i32, i32, i32) {
    %c0_i32 = arith.constant 0 : i32
    %c0_i32_0 = arith.constant 0 : i32
    return %arg0, %arg1, %c0_i32 : i32, i32, i32
  }
  func.func @transform_13(%arg0: i32, %arg1: i32) -> (i32, i32, i32) {
    %c0_i32 = arith.constant 0 : i32
    %c0_i32_0 = arith.constant 0 : i32
    return %arg0, %arg1, %c0_i32 : i32, i32, i32
  }
  func.func @transform_14(%arg0: i32, %arg1: i32) -> (i32, i32, i32) {
    %c0_i32 = arith.constant 0 : i32
    %c0_i32_0 = arith.constant 0 : i32
    return %arg0, %arg1, %c0_i32 : i32, i32, i32
  }
  func.func @transform_15(%arg0: i32, %arg1: i32) -> (i32, i32, i32) {
    %c0_i32 = arith.constant 0 : i32
    %c0_i32_0 = arith.constant 0 : i32
    %c0_i32_1 = arith.constant 0 : i32
    return %arg0, %c0_i32, %c0_i32_0 : i32, i32, i32
  }
  func.func @transform_16(%arg0: i32, %arg1: i32) -> (i32, i32, i32) {
    %c0_i32 = arith.constant 0 : i32
    %c0_i32_0 = arith.constant 0 : i32
    %c0_i32_1 = arith.constant 0 : i32
    return %arg0, %c0_i32, %c0_i32_0 : i32, i32, i32
  }
  func.func @transform_17(%arg0: i32, %arg1: i32) -> (i32, i32, i32) {
    %c0_i32 = arith.constant 0 : i32
    %c0_i32_0 = arith.constant 0 : i32
    %c0_i32_1 = arith.constant 0 : i32
    return %arg0, %c0_i32, %c0_i32_0 : i32, i32, i32
  }
}

</mosaic_0001>

<bundles_post_ra>
// kernel: action_classification_forward.1
= control target key start
LH: loop header
LB: loop body
LE: loop exit
PB: predicated region body
PF: predicated region fallthrough
CT: control target
= control target key end

     0   :  { %s2666_s0 = inlined_call_operand.vmem [shape: f32[2,8,32], index: 0, kind: input, shape index: {}]   ;;  %s2667_s1 = inlined_call_operand.vmem [shape: f32[2,8,32], index: 1, kind: input, shape index: {}]   ;;  %s2668_s2 = inlined_call_operand.vmem [shape: bf16[2,32,256], index: 2, kind: input, shape index: {}]   ;;  %s2669_s3 = inlined_call_operand.vmem [shape: f32[2,1,256], index: 3, kind: input, shape index: {}]   ;;  %s2670_s4 = inlined_call_operand.vmem [shape: f32[2,1,256], index: 4, kind: input, shape index: {}]   ;;  %s2671_s5 = inlined_call_operand.vmem [shape: f32[2], index: 5, kind: input, shape index: {}]   ;;  %s2672_s6 = inlined_call_operand.vmem [shape: bf16[2,32,20], index: 6, kind: input, shape index: {}]   ;;  %s2673_s7 = inlined_call_operand.vmem [shape: f32[2,1,20], index: 7, kind: input, shape index: {}]   ;;  %s2674_s8 = inlined_call_operand.vmem [shape: f32[2,32,20], index: 8, kind: input, shape index: {}]   ;;  %s2675_s9 = inlined_call_operand.vmem [shape: f32[32,20], index: 9, kind: input, shape index: {}]   ;;  %s2676_s10 = inlined_call_operand.vmem [shape: f32[1,20], index: 10, kind: input, shape index: {}]   ;;  %s2677_s11 = inlined_call_operand.vmem [shape: f32[2,8,1], index: 11, kind: output, shape index: {0}]   ;;  %s2678_s12 = inlined_call_operand.vmem [shape: f32[2,8,1], index: 12, kind: output, shape index: {1}]   ;;  %s2679_s13 = inlined_call_operand.hbm [shape: f32[2,8,20], index: 13, kind: output, shape index: {2}]   ;;  %s2680_s14 = inlined_call_operand.hbm [shape: f32[2,8,20], index: 14, kind: output, shape index: {3}]   ;;  %s2681_s15 = inlined_call_operand.hbm [shape: f32[2,1,20], index: 15, kind: output, shape index: {4}]   ;;  %s2682_s16 = inlined_call_operand.hbm [shape: f32[2,1,20], index: 16, kind: output, shape index: {5}]   ;;  %s2683_s17 = inlined_call_operand.hbm [shape: f32[2,1,20], index: 17, kind: output, shape index: {6}]  }
   0x1   :  { %2694 = sst [smem:[#allocation24_spill]] %s2666_s0 }
   0x2   :  { %2695 = sst [smem:[#allocation25_spill]] %s2667_s1 }
   0x3   :  { %2696 = sst [smem:[#allocation26_spill]] %s2668_s2 }
   0x4   :  { %2697 = sst [smem:[#allocation27_spill]] %s2669_s3 }
   0x5   :  { %2698 = sst [smem:[#allocation28_spill]] %s2670_s4 }
   0x6   :  { %2699 = sst [smem:[#allocation29_spill]] %s2671_s5 }
   0x7   :  { %2700 = sst [smem:[#allocation30_spill]] %s2683_s17 }
   0x8   :  { %23 = vsyncpa [#allocation6], 0 }
   0x9   :  { %24 = vsyncpa [#allocation5], 0 }
   0xa   :  { %26 = vsyncpa [#allocation5 + $0x1], 0 }
   0xb   :  { %27 = vsyncpa [#allocation9], 0 }
   0xc   :  { %29 = vsyncpa [#allocation9 + $0x1], 0 }
   0xd   :  { %30 = vsyncpa [#allocation12], 0 }
   0xe   :  { %32 = vsyncpa [#allocation12 + $0x1], 0  ;;  %s2244_s24 = smov 0   ;;  %s2246_s25 = smov 0  }
   0xf   :  { %s2248_s26 = smov 0   ;;  %s2250_s27 = smov 0  }
  0x10   :  { %s2252_s28 = smov 0   ;;  %s2254_s29 = smov 0  }
  0x11 LB: > { %2701 = sst [smem:[#allocation18_spill]] %s2123_s24  ;;  %s2275_s0 = sadd.s32 4294967295, %s2143_s29   ;;  %s2143_s29 = sphi %s2254_s29, %s38_s29   ;;  %s2139_s28 = sphi %s2252_s28, %s2727_s28   ;;  %s2135_s27 = sphi %s2250_s27, %s2726_s27   ;;  %s2131_s26 = sphi %s2248_s26, %s2725_s26   ;;  %s2127_s25 = sphi %s2246_s25, %s2729_s25   ;;  %s2123_s24 = sphi %s2244_s24, %s2728_s24  }
  0x12   : > { %2702 = sst [smem:[#allocation19_spill]] %s2131_s26  ;;  %s2686_s30 = sadd.s32 4294967294, %s2143_s29  }
  0x13   : > { %2703 = sst [smem:[#allocation20_spill]] %s2139_s28  ;;  %s50_s18 = sadd.s32 1, %s2139_s28 }
  0x14   : > { %s360_s19 = sadd.s32 1, %s2131_s26  ;;  %p52_p0 = scmp.ge.s32.totalorder %s50_s18, 2 }
  0x15   : > { %p370_p1 = scmp.ne.s32.totalorder %s2131_s26, %s2127_s25  ;;  %p371_p2 = scmp.eq.s32.totalorder %s2275_s0, 1 }
  0x16   : > { %p376_p3 = scmp.ne.s32.totalorder %s2127_s25, %s2123_s24  ;;  %s2731_s18 = smov (%p52_p0, %s50_s18), 0 }
  0x17   : > { %2704 = sst [smem:[#allocation21_spill]] %s2731_s18  ;;  %p2287_p4 = por %p371_p2, %p370_p1 }
  0x18   : > { %p377_p5 = scmp.eq.s32.totalorder %s2686_s30, 1  ;;  %s355_s20 = ssub.s32 %s2139_s28, %s2731_s18 }
  0x19   : > { %p1693_p6 = scmp.ge.s32.totalorder %s2143_s29, 1  ;;  %p358_p7 = scmp.eq.s32.totalorder %s355_s20, 0 }
  0x1a   : > { %p2296_p8 = por %p377_p5, %p376_p3  ;;  %p490_p9 = scmp.lt.s32.totalorder %s2143_s29, 3 }
  0x1b   : > { %s2302_s22 = scalar_select %p358_p7, %s2131_s26, %s360_s19  }
  0x1c   : > { %s2706_s21 = scalar_select %p2296_p8, 1, 0 }
  0x1d   : > { %2708 = sst [smem:[#allocation23_spill]] %s2302_s22  ;;  %p2304_p10 = pnand %p1693_p6, %p490_p9 }
  0x1e   : > { %2707 = sst [smem:[#allocation22_spill]] %s2706_s21  ;;  %p1857_p11 = scmp.eq.s32.totalorder %s2275_s0, 0 }
  0x1f   : > { %s2710_s5 = sld [smem:[#allocation29_spill]]  ;;  %p1837_p12 = pneg %p2304_p10 }
  0x21   : > { %p1838_p13 = pnand %p1857_p11, %p1837_p12 }
  0x23   : > { %p1938_p1 = pneg %p1838_p13 }
  0x25   : > { %s512_s30 = sshll.u32 %s2710_s5, 4  ;;  %s513_s30 = int_to_ptr.vmem [resolvable:$true] %s512_s30 }
  0x26   : > { %s1936_s20 = scalar_lea.vmem %s513_s30, 16  ;;  %p1944_p5 = scmp.lt.s32.totalorder %s513_s30, %s513_s30 }
  0x27   : > { %p1937_p0 = scmp.ne.s32.totalorder %s513_s30, %s1936_s20  ;;  %p1945_p6 = scmp.lt.s32.totalorder %s1936_s20, %s1936_s20 }
  0x29   : > { %p1939_p2 = pnand %p1938_p1, %p1937_p0  ;;  %p1946_p7 = por %p1945_p6, %p1944_p5 }
  0x2b   : > { %p1940_p3 = pneg %p1939_p2 }
  0x2d   : > { %p1947_p9 = pnand %p1946_p7, %p1940_p3 }
  0x2f   : > { %1950 = shalt.err (!%p1947_p9)
}
  0x30   : > { %s2145_s19 = smov [#allocation4]   ;;  %560 = sbr.rel (%p2304_p10) target bundleno = 728 (0x2d8), region = 64 }
  0x31   : > { %1840 = dma.vmem_to_smem (!%p1838_p13), %s513_s30, 16, %s2145_s19, [#allocation6]  }
  0x35   : > { %2106 = dma.done.wait (%p1857_p11), [#allocation6], 16  }
  0x36   : > { %2108 = vsyncadd (%p1857_p11), [#allocation6], 4294967280 }
  0x37   : > { %566 = sfence }
  0x38   : > { %s2711_s2 = sld [smem:[#allocation26_spill]]  ;;  %p653_p12 = scmp.lt.s32.totalorder %s2135_s27, 1  ;;  %v2146_v2 = vmov 0   ;;  %vm727_vm0 = vcmask 261120   ;;  %vm686_vm1 = vcmask 253952   ;;  %v2147_v13 = vmov 0.0  }
  0x39   : > { %763 = vmatprep.mubr.bf16.mxu0 %v2146_v2  ;;  %s2712_s26 = sld [smem:[#allocation24_spill]]  ;;  %687 = vst.msk [vmem:[#allocation2] sm:$0x1] %vm686_vm1, %v2147_v13  ;;  %688 = vst.msk [vmem:[#allocation3] sm:$0x1] %vm686_vm1, %v2147_v13  ;;  %1774 = vmatprep.subr.bf16.mxu1 %v2147_v13  ;;  %v697_v14 = vlaneseq  ;;  %v1924_v52 = vld [vmem:[%s2672_s6 + $0x8] sm:$0xff]  }
  0x3a   : > { %s654_s19 = scalar_select %p653_p12, %s2135_s27, 1  ;;  %1775 = vmatpush3.bf16.msra.mxu1 %v1924_v52  ;;  %v1925_v53 = vld [vmem:[%s2672_s6] sm:$0xff]   ;;  %vm2148_vm2 = vmmov 0   ;;  %v1926_v54 = vld [vmem:[%s2672_s6 + $0x18] sm:$0xff]   ;;  %v1927_v55 = vld [vmem:[%s2672_s6 + $0x10] sm:$0xff]   ;;  %vm800_vm3 = vcmask 7168  }
  0x3b   : > { %v698_v15 = vshrl.u32 %v697_v14, 7  ;;  %s2714_s3 = sld [smem:[#allocation27_spill]]  ;;  %1776 = vmatprep.subr.bf16.mxu1 %v2147_v13  ;;  %1778 = vmatprep.mubr.msk.bf16.mxu1 %vm2148_vm2, %v2147_v13  ;;  %v1078_v56 = vld [vmem:[%s2674_s8 + $0x18] sm:$0xff]  ;;  %v1077_v57 = vld [vmem:[%s2674_s8 + $0x10] sm:$0xff]  ;;  %v1076_v58 = vld [vmem:[%s2674_s8 + $0x8] sm:$0xff]  ;;  %s2489_s22 = sand.u32 1, %s2127_s25  }
  0x3c   : > { %s2336_s17 = sshll.u32 %s654_s19, 3  ;;  %s2715_s4 = sld [smem:[#allocation28_spill]]  ;;  %v1075_v59 = vld [vmem:[%s2674_s8] sm:$0xff]  ;;  %v1740_v60 = vld [vmem:[%s2674_s8 + $0x38] sm:$0xff]  ;;  %v1739_v61 = vld [vmem:[%s2674_s8 + $0x30] sm:$0xff]  ;;  %vm877_vm4 = vcmask 162816  }
  0x3d   : > { %v699_v16 = vsub.s32 0, %v698_v15  ;;  %v703_v18 = vsub.s32 1, %v698_v15  ;;  %v1738_v62 = vld [vmem:[%s2674_s8 + $0x28] sm:$0xff]  ;;  %v1737_v63 = vld [vmem:[%s2674_s8 + $0x20] sm:$0xff]  ;;  %s791_s5 = sld [smem:[#allocation4]]  ;;  %s673_s28 = scalar_lea.vmem %s2677_s11, %s2336_s17 }
  0x3e   : > { %v1912_v0 = vld [vmem:[%s2711_s2 + $0x14] ss:$8 sps:$4 sm:$0xff]   ;;  %v1914_v1 = vld [vmem:[%s2711_s2 + $0x10] ss:$8 sps:$4 sm:$0xff]   ;;  %v1915_v3 = vld [vmem:[%s2711_s2 + $0x4] ss:$8 sps:$4 sm:$0xff]   ;;  %1777 = vmatpush3.bf16.msra.mxu1 %v1925_v53  ;;  %s680_s19 = scalar_lea.vmem %s2678_s12, %s2336_s17 }
  0x3f   : > { %743 = vmatprep.subr.bf16.mxu0 %v1912_v0  ;;  %v1917_v4 = vld [vmem:[%s2711_s2] ss:$8 sps:$4 sm:$0xff]   ;;  %v1920_v5 = vld [vmem:[%s2711_s2 + $0x34] ss:$8 sps:$4 sm:$0xff]   ;;  %s659_s30 = scalar_lea.vmem %s2712_s26, %s2336_s17  ;;  %v1918_v6 = vld [vmem:[%s2711_s2 + $0x30] ss:$8 sps:$4 sm:$0xff]   ;;  %1782 = vmatprep.subr.bf16.mxu1 %v2147_v13 }
  0x40   : > { %744 = vmatpush1.bf16.msra.mxu0 %v1914_v1  ;;  %v2348_v7 = vld [vmem:[%s659_s30] sm:$0xff]  ;;  %s2713_s26 = sld [smem:[#allocation25_spill]] }
  0x41   : > { %745 = vmatprep.subr.bf16.mxu0 %v1915_v3  ;;  %v2352_v8 = vpack.c.bf16 %v2348_v7, %v2348_v7  ;;  %v1923_v9 = vld [vmem:[%s2711_s2 + $0x24] ss:$8 sps:$4 sm:$0xff]   ;;  %v1921_v10 = vld [vmem:[%s2711_s2 + $0x20] ss:$8 sps:$4 sm:$0xff]   ;;  %s1725_s20 = sld [smem:[#allocation4 + $0x1]] }
  0x42   : > { %v695_v17 = vld [vmem:[%s2714_s3] sm:$0x3]  ;;  %v1718_v25 = vld [vmem:[%s2714_s3 + $0x2] sm:$0x3] }
  0x43   : > { %v700_v19 = vrot.slane %v695_v17, %v699_v16  ;;  %v704_v20 = vrot.slane %v695_v17, %v703_v18  ;;  %v774_v22 = vld [vmem:[%s2715_s4] sm:$0x3]  ;;  %v892_v32 = vrot.slane %v1718_v25, %v699_v16  ;;  %v896_v34 = vrot.slane %v1718_v25, %v703_v18  ;;  %v1724_v38 = vld [vmem:[%s2715_s4 + $0x2] sm:$0x3]  ;;  %1779 = vmatmul.mubr.msk.bf16.vlgmr.msra.gmra.mxu1 %vm727_vm0, %v2352_v8 }
  0x44   : > { %746 = vmatpush1.bf16.msra.mxu0 %v1917_v4  ;;  %v779_v28 = vrot.slane %v774_v22, %v699_v16  ;;  %v783_v29 = vrot.slane %v774_v22, %v703_v18  ;;  %v971_v43 = vrot.slane %v1724_v38, %v699_v16  ;;  %v975_v45 = vrot.slane %v1724_v38, %v703_v18  ;;  %v1237_v38 = vld [vmem:[%s2675_s9 + $0x8] sm:$0xff] }
  0x45   : > { %934 = vmatprep.subr.bf16.mxu0 %v1920_v5  ;;  %1783 = vmatpush3.bf16.msra.mxu1 %v1926_v54  ;;  %v792_v0 = vstv %s791_s5  ;;  %s2691_s5 = sand.u32 1, %s2275_s0  }
  0x46   : > { %s666_s24 = scalar_lea.vmem %s2713_s26, %s2336_s17  ;;  %1786 = vmatprep.mubr.msk.bf16.mxu1 %vm2148_vm2, %v2147_v13  ;;  %1784 = vmatprep.subr.bf16.mxu1 %v2147_v13  ;;  %s2507_s2 = scalar_lea.sflag [#allocation9], %s2691_s5 }
  0x47   : > { %1708 = vmatmul.mubr.msk.bf16.vlgmr.msra.gmra.mxu0 %vm727_vm0, %v2352_v8  ;;  %v2366_v11 = vld [vmem:[%s666_s24] sm:$0xff]  ;;  %v984_v4 = vstv %s1725_s20  ;;  %s2692_s20 = sshll.u32 %s2135_s27, 7  ;;  %s2149_s24 = smov [#allocation8]  }
  0x48   : > { %935 = vmatpush1.bf16.msra.mxu0 %v1918_v6  ;;  %954 = vmatprep.mubr.bf16.mxu0 %v2146_v2  ;;  %v2370_v12 = vpack.c.bf16 %v2366_v11, %v2366_v11 }
  0x49   : > { %936 = vmatprep.subr.bf16.mxu0 %v1923_v9  ;;  %1785 = vmatpush3.bf16.msra.mxu1 %v1927_v55 }
  0x4a   : > { %1801 = vmatprep.subr.mxu1 %v2147_v13 }
  0x4c   : > { %937 = vmatpush1.bf16.msra.mxu0 %v1921_v10  ;;  %1787 = vmatmul.mubr.msk.bf16.vlgmr.msra.gmra.mxu1 %vm727_vm0, %v2370_v12 }
  0x4d   : > { %1790 = vmatprep.subr.mxu0 %v2147_v13  ;;  %1809 = vmatprep.mubr.msk.f32.mxu1 %vm2148_vm2, %v2147_v13 }
  0x4e   : > { %1802 = vmatpush3.msra.mxu1 %v1740_v60 }
  0x4f   : > { %1723 = vmatmul.mubr.msk.bf16.vlgmr.msra.gmra.mxu0 %vm727_vm0, %v2370_v12  ;;  %1803 = vmatprep.subr.mxu1 %v2147_v13 }
  0x50   : > { %1798 = vmatprep.mubr.msk.f32.mxu0 %vm2148_vm2, %v2147_v13  ;;  %1791 = vmatpush3.msra.mxu0 %v1078_v56 }
  0x51   : > { %1792 = vmatprep.subr.mxu0 %v2147_v13  ;;  %1804 = vmatpush3.msra.mxu1 %v1739_v61 }
  0x52   : > { %1793 = vmatpush3.msra.mxu0 %v1077_v57  ;;  %1805 = vmatprep.subr.mxu1 %v2147_v13 }
  0x53   : > { %1794 = vmatprep.subr.mxu0 %v2147_v13  ;;  %1806 = vmatpush3.msra.mxu1 %v1738_v62 }
  0x54   : > { %1795 = vmatpush3.msra.mxu0 %v1076_v58  ;;  %1807 = vmatprep.subr.mxu1 %v2147_v13 }
  0x55   : > { %1796 = vmatprep.subr.mxu0 %v2147_v13  ;;  %1808 = vmatpush3.msra.mxu1 %v1737_v63 }
  0x56   : > { %1797 = vmatpush3.msra.mxu0 %v1075_v59 }
  0x57   : > { %1812 = vmatprep.subr.mxu0 %v2147_v13 }
 0x107   : > { %v765_v21 = vpop.f32.mrf.mxu0 }
 0x108   : > { %v766_v23 = vadd.f32 %v765_v21, %v700_v19 }
 0x109   : > { %v767_v24 = vpop.f32.mrf.mxu0 }
 0x10a   : > { %v772_v26 = vmax.f32 %v766_v23, 0.0  ;;  %v768_v27 = vadd.f32 %v767_v24, %v704_v20 }
 0x10b   : > { %v769_v30 = vpop.f32.mrf.mxu0 }
 0x10c   : > { %v773_v31 = vmax.f32 %v768_v27, 0.0  ;;  %v786_v35 = vmul.f32 %v779_v28, %v772_v26  ;;  %v802_v27 = vld [vmem:[#allocation2] sm:$0x1] }
 0x10d   : > { %v770_v33 = vpop.f32.mrf.mxu0 }
 0x10e   : > { %v787_v36 = vmul.f32 %v783_v29, %v773_v31  ;;  %v993_v33 = vld [vmem:[#allocation3] sm:$0x1] }
 0x10f   : > { %v956_v37 = vpop.f32.mrf.mxu0 }
 0x110   : > { %v957_v39 = vadd.f32 %v956_v37, %v892_v32  ;;  %v788_v40 = vadd.f32 %v787_v36, %v786_v35  ;;  %v1238_v37 = vld [vmem:[%s2675_s9 + $0x10] sm:$0xff] }
 0x111   : > { %v958_v41 = vpop.f32.mrf.mxu0 }
 0x112   : > { %v963_v42 = vmax.f32 %v957_v39, 0.0  ;;  %v959_v44 = vadd.f32 %v958_v41, %v896_v34  ;;  %789 = vadd.xlane.f32.xlu0 %v788_v40  ;;  %v1236_v39 = vld [vmem:[%s2675_s9] sm:$0xff] }
 0x113   : > { %v960_v46 = vpop.f32.mrf.mxu0 }
 0x114   : > { %v964_v47 = vmax.f32 %v959_v44, 0.0  ;;  %v978_v49 = vmul.f32 %v971_v43, %v963_v42  ;;  %v871_v42 = vpop.f32.mrf.mxu1  ;;  %v1710_v43 = vld [vmem:[%s2673_s7] ss:$0 sm:$0xff] }
 0x115   : > { %v961_v48 = vpop.f32.mrf.mxu0 }
 0x116   : > { %v979_v50 = vmul.f32 %v975_v45, %v964_v47  ;;  %v1780_v44 = vpop.f32.mrf.mxu1  ;;  %v1732_v48 = vld [vmem:[%s2673_s7 + $0x1] ss:$0 sm:$0xff] }
 0x118   : > { %v980_v51 = vadd.f32 %v979_v50, %v978_v49  ;;  %v874_v45 = vpop.f32.mrf.mxu1 }
 0x11a   : > { %981 = vadd.xlane.f32.xlu0 %v980_v51  ;;  %v1781_v46 = vpop.f32.mrf.mxu1 }
 0x11c   : > { %v1063_v47 = vpop.f32.mrf.mxu1 }
 0x11d   : > { %v1064_v51 = vadd.f32 %v1732_v48, %v1063_v47 }
 0x11e   : > { %v1788_v49 = vpop.f32.mrf.mxu1 }
 0x120   : > { %v1066_v50 = vpop.f32.mrf.mxu1 }
 0x122   : > { %v1789_v52 = vpop.f32.mrf.mxu1 }
 0x19b   : > { %v790_v1 = vpop.xlane.xlu0 %789 }
 0x19c   : > { %v793_v2 = vadd.f32 %v792_v0, %v790_v1 }
 0x19e   : > { %v1709_v3 = vmul.f32 -1.442695, %v793_v2 }
 0x1a0   : > { %1928 = vpow2.f32 %v1709_v3 }
 0x1a3   : > { %v982_v5 = vpop.xlane.xlu0 %981 }
 0x1a4   : > { %v985_v6 = vadd.f32 %v984_v4, %v982_v5 }
 0x1a6   : > { %v1726_v8 = vmul.f32 -1.442695, %v985_v6 }
 0x1a8   : > { %1930 = vpow2.f32 %v1726_v8 }
 0x1ad   : > { %v1929_v9 = vpop.eup %1928 }
 0x1ae   : > { %v797_v10 = vadd.f32 1.0, %v1929_v9 }
 0x1b0   : > { %1932 = vrcp.f32 %v797_v10 }
 0x1b5   : > { %v1931_v12 = vpop.eup %1930 }
 0x1b6   : > { %v989_v14 = vadd.f32 1.0, %v1931_v12 }
 0x1b8   : > { %1934 = vrcp.f32 %v989_v14 }
 0x1bd   : > { %v1933_v15 = vpop.eup %1932 }
 0x1be   : > { %801 = vst.msk [vmem:[%s673_s28] sm:$0xff] %vm800_vm3, %v1933_v15  ;;  %v803_v16 = vmul.f32 %v1933_v15, %v2348_v7  ;;  %s1379_s28 = scalar_lea.hbm %s2680_s14, %s2692_s20 }
 0x1c0   : > { %v804_v17 = vsel %vm727_vm0, %v803_v16, 0.0 }
 0x1c1   : > { %v805_v18 = vrot.slane %v804_v17, 4 }
 0x1c3   : > { %v806_v19 = vadd.f32 %v805_v18, %v804_v17 }
 0x1c5   : > { %v1935_v20 = vpop.eup %1934  ;;  %v807_v21 = vrot.slane %v806_v19, 2 }
 0x1c6   : > { %992 = vst.msk [vmem:[%s680_s19] sm:$0xff] %vm800_vm3, %v1935_v20  ;;  %v994_v22 = vmul.f32 %v1935_v20, %v2366_v11  ;;  %v1239_v11 = vld [vmem:[%s2675_s9 + $0x18] sm:$0xff]  ;;  %s1698_s19 = sshll.u32 %s2489_s22, 3 }
 0x1c7   : > { %v808_v23 = vadd.f32 %v807_v21, %v806_v19  ;;  %s2492_s17 = scalar_lea.vmem [#allocation7], %s1698_s19  ;;  %s634_s21 = scalar_lea.vmem [#allocation8], %s1698_s19 }
 0x1c8   : > { %v995_v24 = vsel %vm727_vm0, %v994_v22, 0.0  ;;  %1069 = vst.msk [vmem:[%s634_s21] sm:$0xff] %vm877_vm4, %v1064_v51  ;;  %s1381_s18 = sshll.u32 %s634_s21, 4  ;;  %s1955_s19 = sshll.u32 %s2149_s24, 4  ;;  %s1382_s18 = int_to_ptr.vmem [resolvable:$true] %s1381_s18  ;;  %s1956_s19 = int_to_ptr.vmem [resolvable:$false] %s1955_s19 }
 0x1c9   : > { %v809_v25 = vrot.slane %v808_v23, 1  ;;  %v996_v26 = vrot.slane %v995_v24, 4  ;;  %s1951_s26 = scalar_lea.vmem %s1382_s18, 128  ;;  %s1957_s3 = scalar_lea.vmem %s1956_s19, 256 }
 0x1ca   : > { %p1952_p10 = scmp.ne.s32.totalorder %s1382_s18, %s1951_s26  ;;  %p1958_p0 = scmp.lt.s32.totalorder %s1382_s18, %s1956_s19 }
 0x1cb   : > { %v810_v7 = vadd.f32 %v809_v25, %v808_v23  ;;  %v997_v28 = vadd.f32 %v996_v26, %v995_v24  ;;  %p1959_p1 = scmp.lt.s32.totalorder %s1957_s3, %s1951_s26 }
 0x1cc   : > { %p1953_p11 = pnand %p1952_p10, %p2287_p4 }
 0x1cd   : > { %v811_v29 = vadd.f32 %v810_v7, %v802_v27  ;;  %v998_v30 = vrot.slane %v997_v28, 2  ;;  %p1960_p2 = por %p1959_p1, %p1958_p0 }
 0x1ce   : > { %p1954_p13 = pneg %p1953_p11 }
 0x1cf   : > { %813 = vst.msk [vmem:[#allocation2] sm:$0x1] %vm686_vm1, %v811_v29  ;;  %v999_v31 = vadd.f32 %v998_v30, %v997_v28 }
 0x1d0   : > { %p1961_p3 = pnand %p1960_p2, %p1954_p13 }
 0x1d1   : > { %v1000_v32 = vrot.slane %v999_v31, 1 }
 0x1d3   : > { %v1001_v34 = vadd.f32 %v1000_v32, %v999_v31 }
 0x1d5   : > { %v1002_v35 = vadd.f32 %v1001_v34, %v993_v33 }
 0x1d6   : > { %v1073_v36 = vld [vmem:[#allocation2] sm:$0x1] }
 0x1d7   : > { %1003 = vst.msk [vmem:[#allocation3] sm:$0x1] %vm686_vm1, %v1002_v35  ;;  %1799 = vmatmul.mubr.msk.f32.vlgmr.msra.gmra.mxu0 %vm727_vm0, %v1073_v36 }
 0x1d8   : > { %1813 = vmatpush3.msra.mxu0 %v1239_v11  ;;  %1820 = vmatprep.mubr.msk.f32.mxu0 %vm2148_vm2, %v2147_v13 }
 0x1d9   : > { %1814 = vmatprep.subr.mxu0 %v2147_v13 }
 0x1da   : > { %1815 = vmatpush3.msra.mxu0 %v1238_v37 }
 0x1db   : > { %1816 = vmatprep.subr.mxu0 %v2147_v13 }
 0x1dc   : > { %1817 = vmatpush3.msra.mxu0 %v1237_v38 }
 0x1dd   : > { %1818 = vmatprep.subr.mxu0 %v2147_v13  ;;  %v872_v13 = vadd.f32 %v1710_v43, %v871_v42 }
 0x1de   : > { %v1074_v40 = vld [vmem:[#allocation3] sm:$0x1]  ;;  %1819 = vmatpush3.msra.mxu0 %v1236_v39 }
 0x1df   : > { %1810 = vmatmul.mubr.msk.f32.vlgmr.msra.gmra.mxu1 %vm727_vm0, %v1074_v40  ;;  %v1235_v41 = vadd.f32 %v1074_v40, %v1073_v36  ;;  %878 = vst.msk [vmem:[%s2492_s17] sm:$0xff] %vm877_vm4, %v872_v13 }
 0x1e1   : > { %1821 = vmatmul.mubr.msk.f32.vlgmr.msra.gmra.mxu0 %vm727_vm0, %v1235_v41 }
 0x1e2   : > { %1964 = shalt.err (!%p1961_p3)
}
 0x1e3   : > { %s1965_s30 = scalar_lea.hbm %s1379_s28, 128  ;;  %s1969_s5 = scalar_lea.hbm %s2680_s14, 256 }
 0x1e4   : > { %p1966_p5 = scmp.ne.s32.totalorder %s1379_s28, %s1965_s30  ;;  %p1970_p9 = scmp.lt.s32.totalorder %s1379_s28, %s2680_s14 }
 0x1e5   : > { %p1971_p12 = scmp.lt.s32.totalorder %s1969_s5, %s1965_s30 }
 0x1e6   : > { %p1967_p6 = pnand %p1966_p5, %p2287_p4 }
 0x1e7   : > { %p1972_p10 = por %p1971_p12, %p1970_p9 }
 0x1e8   : > { %p1968_p7 = pneg %p1967_p6 }
 0x1ea   : > { %p1973_p11 = pnand %p1972_p10, %p1968_p7 }
 0x1ec   : > { %1976 = shalt.err (!%p1973_p11)
}
 0x1ed   : > { %1828 = dma.vmem_to_hbm [thread:$0]  (%p2287_p4), %s1382_s18, 128, %s1379_s28, %s2507_s2  }
 0x1ee   : > { %s2716_s3 = sshll.u32 %s2135_s27, 7  ;;  %s1367_s21 = sshll.u32 %s2492_s17, 4  ;;  %s1368_s21 = int_to_ptr.vmem [resolvable:$true] %s1367_s21 }
 0x1ef   : > { %s1365_s19 = scalar_lea.hbm %s2679_s13, %s2716_s3  ;;  %s1330_s4 = scalar_lea.sflag [#allocation5], %s2489_s22 }
 0x1f0   : > { %s1977_s5 = scalar_lea.vmem %s1368_s21, 128  ;;  %s2150_s20 = smov [#allocation7]  }
 0x1f1   : > { %p1978_p13 = scmp.ne.s32.totalorder %s1368_s21, %s1977_s5  ;;  %s1981_s30 = sshll.u32 %s2150_s20, 4  ;;  %s1982_s30 = int_to_ptr.vmem [resolvable:$false] %s1981_s30 }
 0x1f2   : > { %s1983_s23 = scalar_lea.vmem %s1982_s30, 256  ;;  %p1984_p2 = scmp.lt.s32.totalorder %s1368_s21, %s1982_s30 }
 0x1f3   : > { %p1979_p0 = pnand %p1978_p13, %p2287_p4  ;;  %p1985_p3 = scmp.lt.s32.totalorder %s1983_s23, %s1977_s5 }
 0x1f5   : > { %p1980_p1 = pneg %p1979_p0  ;;  %p1986_p5 = por %p1985_p3, %p1984_p2 }
 0x1f7   : > { %p1987_p6 = pnand %p1986_p5, %p1980_p1 }
 0x1f9   : > { %1990 = shalt.err (!%p1987_p6)
}
 0x1fa   : > { %s1991_s28 = scalar_lea.hbm %s1365_s19, 128  ;;  %s1995_s3 = scalar_lea.hbm %s2679_s13, 256 }
 0x1fb   : > { %p1992_p7 = scmp.ne.s32.totalorder %s1365_s19, %s1991_s28  ;;  %p1996_p10 = scmp.lt.s32.totalorder %s1365_s19, %s2679_s13 }
 0x1fc   : > { %p1997_p11 = scmp.lt.s32.totalorder %s1995_s3, %s1991_s28 }
 0x1fd   : > { %p1993_p9 = pnand %p1992_p7, %p2287_p4 }
 0x1fe   : > { %p1998_p13 = por %p1997_p11, %p1996_p10 }
 0x1ff   : > { %p1994_p12 = pneg %p1993_p9 }
 0x201   : > { %p1999_p0 = pnand %p1998_p13, %p1994_p12 }
 0x203   : > { %2002 = shalt.err (!%p1999_p0)
}
 0x204   : > { %1827 = dma.vmem_to_hbm [thread:$0]  (%p2287_p4), %s1368_s21, 128, %s1365_s19, %s1330_s4   ;;  %v1079_v53 = vld [vmem:[%s2673_s7] sm:$0x1]  ;;  %vm1153_vm5 = vcmask 155648  }
 0x205   : > { %s2545_s30 = sshll.u32 %s2135_s27, 4  ;;  %s640_s23 = scalar_lea.vmem [#allocation10], %s2489_s22 }
 0x206   : > { %s1394_s17 = sshll.u32 %s640_s23, 4  ;;  %s1392_s3 = scalar_lea.hbm %s2681_s15, %s2545_s30  ;;  %s1395_s17 = int_to_ptr.vmem [resolvable:$true] %s1394_s17 }
 0x207   : > { %s2003_s19 = scalar_lea.vmem %s1395_s17, 16  ;;  %s2151_s27 = smov [#allocation10]  }
 0x208   : > { %p2004_p1 = scmp.ne.s32.totalorder %s1395_s17, %s2003_s19  ;;  %s2007_s21 = sshll.u32 %s2151_s27, 4  ;;  %s2008_s21 = int_to_ptr.vmem [resolvable:$false] %s2007_s21 }
 0x209   : > { %s2009_s4 = scalar_lea.vmem %s2008_s21, 32  ;;  %p2010_p5 = scmp.lt.s32.totalorder %s1395_s17, %s2008_s21 }
 0x20a   : > { %p2005_p2 = pnand %p2004_p1, %p2287_p4  ;;  %p2011_p6 = scmp.lt.s32.totalorder %s2009_s4, %s2003_s19 }
 0x20c   : > { %p2006_p3 = pneg %p2005_p2  ;;  %p2012_p7 = por %p2011_p6, %p2010_p5 }
 0x20e   : > { %p2013_p9 = pnand %p2012_p7, %p2006_p3 }
 0x297   : > { %v1149_v54 = vpop.f32.mrf.mxu0 }
 0x298   : > { %v1150_v55 = vadd.f32 %v1149_v54, %v1079_v53 }
 0x299   : > { %v1800_v56 = vpop.f32.mrf.mxu0 }
 0x29a   : > { %1154 = vst.msk [vmem:[%s640_s23] sm:$0x1] %vm1153_vm5, %v1150_v55 }
 0x29b   : > { %2016 = shalt.err (!%p2013_p9)
}
 0x29c   : > { %s2017_s26 = scalar_lea.hbm %s1392_s3, 16  ;;  %s2021_s20 = scalar_lea.hbm %s2681_s15, 32 }
 0x29d   : > { %p2018_p12 = scmp.ne.s32.totalorder %s1392_s3, %s2017_s26  ;;  %p2022_p13 = scmp.lt.s32.totalorder %s1392_s3, %s2681_s15 }
 0x29e   : > { %p2023_p0 = scmp.lt.s32.totalorder %s2021_s20, %s2017_s26 }
 0x29f   : > { %p2019_p10 = pnand %p2018_p12, %p2287_p4 }
 0x2a0   : > { %p2024_p1 = por %p2023_p0, %p2022_p13 }
 0x2a1   : > { %p2020_p11 = pneg %p2019_p10 }
 0x2a3   : > { %p2025_p2 = pnand %p2024_p1, %p2020_p11 }
 0x2a5   : > { %2028 = shalt.err (!%p2025_p2)
}
 0x2a6   : > { %1829 = dma.vmem_to_hbm [thread:$0]  (%p2287_p4), %s1395_s17, 16, %s1392_s3, %s2507_s2   ;;  %v1741_v57 = vld [vmem:[%s2673_s7 + $0x1] sm:$0x1]  ;;  %v1230_v58 = vpop.f32.mrf.mxu1  ;;  %v1240_v59 = vld [vmem:[%s2676_s10] sm:$0x1]  ;;  %v1310_v62 = vpop.f32.mrf.mxu0 }
 0x2a7   : > { %s646_s27 = scalar_lea.vmem [#allocation11], %s2489_s22  ;;  %s2693_s24 = scalar_lea.vmem [#allocation13], %s2489_s22  ;;  %v1231_v60 = vadd.f32 %v1741_v57, %v1230_v58  ;;  %v1311_v63 = vadd.f32 %v1310_v62, %v1240_v59 }
 0x2a8   : > { %s1407_s21 = sshll.u32 %s646_s27, 4  ;;  %s1420_s5 = sshll.u32 %s2693_s24, 4  ;;  %v1811_v61 = vpop.f32.mrf.mxu1  ;;  %v1822_v0 = vpop.f32.mrf.mxu0  ;;  %s2582_s21 = int_to_ptr.vmem [resolvable:$true] %s1407_s21  ;;  %s2591_s5 = int_to_ptr.vmem [resolvable:$true] %s1420_s5 }
 0x2a9   : > { %s2580_s2 = scalar_lea.hbm %s2682_s16, %s2545_s30  ;;  %1234 = vst.msk [vmem:[%s646_s27] sm:$0x1] %vm1153_vm5, %v1231_v60  ;;  %s2717_s28 = sld [smem:[#allocation30_spill]] }
 0x2aa   : > { %s2719_s4 = sand.u32 1, %s2275_s0   ;;  %s2029_s20 = scalar_lea.vmem %s2582_s21, 16 }
 0x2ab   : > { %s2595_s26 = scalar_lea.sflag [#allocation12], %s2719_s4  ;;  %p2030_p3 = scmp.ne.s32.totalorder %s2582_s21, %s2029_s20 }
 0x2ac   : > { %s2152_s23 = smov [#allocation11]  }
 0x2ad   : > { %p2031_p5 = pnand %p2030_p3, %p2287_p4  ;;  %s2033_s24 = sshll.u32 %s2152_s23, 4  ;;  %s2034_s24 = int_to_ptr.vmem [resolvable:$false] %s2033_s24 }
 0x2ae   : > { %s2035_s27 = scalar_lea.vmem %s2034_s24, 32  ;;  %p2036_p7 = scmp.lt.s32.totalorder %s2582_s21, %s2034_s24 }
 0x2af   : > { %s2718_s18 = smov %s2717_s28  ;;  %s2589_s19 = scalar_lea.hbm %s2717_s28, %s2545_s30 }
 0x2b0   : > { %p2032_p6 = pneg %p2031_p5  ;;  %p2037_p9 = scmp.lt.s32.totalorder %s2035_s27, %s2029_s20 }
 0x2b2   : > { %p2038_p12 = por %p2037_p9, %p2036_p7 }
 0x2b4   : > { %p2039_p10 = pnand %p2038_p12, %p2032_p6 }
 0x2b6   : > { %2042 = shalt.err (!%p2039_p10)
}
 0x2b7   : > { %s2043_s0 = scalar_lea.hbm %s2580_s2, 16  ;;  %s2047_s3 = scalar_lea.hbm %s2682_s16, 32 }
 0x2b8   : > { %p2044_p11 = scmp.ne.s32.totalorder %s2580_s2, %s2043_s0  ;;  %p2048_p1 = scmp.lt.s32.totalorder %s2580_s2, %s2682_s16 }
 0x2b9   : > { %p2049_p2 = scmp.lt.s32.totalorder %s2047_s3, %s2043_s0 }
 0x2ba   : > { %p2045_p13 = pnand %p2044_p11, %p2287_p4 }
 0x2bb   : > { %p2050_p3 = por %p2049_p2, %p2048_p1 }
 0x2bc   : > { %p2046_p0 = pneg %p2045_p13 }
 0x2be   : > { %p2051_p5 = pnand %p2050_p3, %p2046_p0 }
 0x2c0   : > { %2054 = shalt.err (!%p2051_p5)
}
 0x2c1   : > { %1830 = dma.vmem_to_hbm [thread:$0]  (%p2287_p4), %s2582_s21, 16, %s2580_s2, %s2595_s26  }
 0x2c2   : > { %s2720_s24 = scalar_lea.vmem [#allocation13], %s2489_s22  ;;  %s2055_s20 = scalar_lea.vmem %s2591_s5, 16 }
 0x2c3   : > { %1314 = vst.msk [vmem:[%s2720_s24] sm:$0x1] %vm1153_vm5, %v1311_v63  ;;  %p2056_p6 = scmp.ne.s32.totalorder %s2591_s5, %s2055_s20  ;;  %s2153_s23 = smov [#allocation13]  }
 0x2c4   : > { %s2059_s27 = sshll.u32 %s2153_s23, 4  ;;  %s2060_s27 = int_to_ptr.vmem [resolvable:$false] %s2059_s27 }
 0x2c5   : > { %p2057_p7 = pnand %p2056_p6, %p2287_p4  ;;  %s2061_s0 = scalar_lea.vmem %s2060_s27, 32 }
 0x2c6   : > { %p2062_p12 = scmp.lt.s32.totalorder %s2591_s5, %s2060_s27  ;;  %p2063_p10 = scmp.lt.s32.totalorder %s2061_s0, %s2055_s20 }
 0x2c7   : > { %p2058_p9 = pneg %p2057_p7 }
 0x2c8   : > { %p2064_p11 = por %p2063_p10, %p2062_p12 }
 0x2ca   : > { %p2065_p13 = pnand %p2064_p11, %p2058_p9 }
 0x2cc   : > { %2068 = shalt.err (!%p2065_p13)
}
 0x2cd   : > { %s2069_s22 = scalar_lea.hbm %s2589_s19, 16  ;;  %s2073_s30 = scalar_lea.hbm %s2718_s18, 32 }
 0x2ce   : > { %p2070_p0 = scmp.ne.s32.totalorder %s2589_s19, %s2069_s22  ;;  %p2074_p3 = scmp.lt.s32.totalorder %s2589_s19, %s2718_s18 }
 0x2cf   : > { %p2075_p5 = scmp.lt.s32.totalorder %s2073_s30, %s2069_s22 }
 0x2d0   : > { %p2071_p1 = pnand %p2070_p0, %p2287_p4 }
 0x2d1   : > { %p2076_p6 = por %p2075_p5, %p2074_p3 }
 0x2d2   : > { %p2072_p2 = pneg %p2071_p1 }
 0x2d4   : > { %p2077_p7 = pnand %p2076_p6, %p2072_p2 }
 0x2d6   : > { %2080 = shalt.err (!%p2077_p7)
}
 0x2d7   : > { %1831 = dma.vmem_to_hbm [thread:$0]  (%p2287_p4), %s2591_s5, 16, %s2589_s19, %s2595_s26  }
 0x2d8 PF: > { %s2721_s28 = sld [smem:[#allocation18_spill]]  ;;  %p1859_p9 = scmp.ge.s32.totalorder %s2143_s29, 2 }
 0x2da   : > { %p1842_p12 = pnand %p1859_p9, %p2296_p8 }
 0x2dc   : > { %p1843_p10 = pneg %p1842_p12 }
 0x2de   : > { %s1452_s24 = sand.u32 1, %s2721_s28  }
 0x2df   : > { %s1453_s20 = scalar_lea.sflag [#allocation5], %s1452_s24 }
 0x2e0   : > { %2110 = dma.done.wait (%p1843_p10), %s1453_s20, 128  }
 0x2e1   : > { %2112 = vsyncadd (%p1843_p10), %s1453_s20, 4294967168  ;;  %s2723_s23 = sadd.s32 4294967294, %s2143_s29  }
 0x2e2   : > { %s1461_s27 = sand.u32 1, %s2723_s23  }
 0x2e3   : > { %s1462_s1 = scalar_lea.sflag [#allocation9], %s1461_s27 }
 0x2e4   : > { %2114 = dma.done.wait (%p1843_p10), %s1462_s1, 144  }
 0x2e5   : > { %2116 = vsyncadd (%p1843_p10), %s1462_s1, 4294967152  ;;  %s1479_s0 = scalar_lea.sflag [#allocation12], %s1461_s27 }
 0x2e6   : > { %2118 = dma.done.wait (%p1843_p10), %s1479_s0, 32  }
 0x2e7   : > { %2120 = vsyncadd (%p1843_p10), %s1479_s0, 4294967264  ;;  %s38_s29 = sadd.s32 1, %s2143_s29   ;;  %s2724_s5 = sld [smem:[#allocation19_spill]] }
 0x2e8   : > { %p35_p4 = scmp.ge.s32.totalorder %s38_s29, 4   ;;  %s2725_s26 = sld [smem:[#allocation23_spill]] }
 0x2e9   : > { %s2726_s27 = sld [smem:[#allocation20_spill]]  ;;  %s2728_s24 = smov %s2127_s25 }
 0x2ea   : > { %s2727_s28 = sld [smem:[#allocation21_spill]]  ;;  %37 = sbr.rel (!%p35_p4) target bundleno = 17 (0x11), region = 209 }
 0x2ed   : > { %s2729_s25 = smov %s2724_s5 }
 0x2ef   :  { %1491 = vsyncpa [#allocation5], 1 }
 0x2f0   :  { %1493 = vsyncpa [#allocation5 + $0x1], 1 }
 0x2f1   :  { %1494 = vsyncpa [#allocation9], 1 }
 0x2f2   :  { %1496 = vsyncpa [#allocation9 + $0x1], 1 }
 0x2f3   :  { %1497 = vsyncpa [#allocation12], 1 }
 0x2f4   :  { %1499 = vsyncpa [#allocation12 + $0x1], 1 }
 0x2f5   :  { %1500 = vsyncpa [#allocation6], 1 }
 0x2f6   :  { %1502 = vsyncpa [#allocation6 + $0x1], 1 }

</bundles_post_ra>
